<compile_context>
chip_gen: v6e
topology: v6e:2x2x1
jax: 0.10.0
libtpu: 0.0.40
codegen_flags: <defaults>
</compile_context>

<pallas_src>
import functools
import math

import jax
import jax.numpy as jnp
from jax.experimental import pallas as pl
from jax.experimental.pallas import tpu as pltpu


def _round_up(x, m):
    return ((x + m - 1) // m) * m


def _mvsdpa_kernel(*refs, inv_temperature, l, d_k, d_v, masked):
    if masked:
        q_ref, k_ref, v_ref, mask_ref, out_t_ref, attn_t_ref = refs
    else:
        q_ref, k_ref, v_ref, out_t_ref, attn_t_ref = refs
        mask_ref = None

    # Natural (rows-on-sublanes) loads straight from the lane-dense DMA tiles.
    q = q_ref[...].astype(jnp.float32)           # (bn, d_k)
    kf = k_ref[...].astype(jnp.float32)          # (bn, l*d_k)
    vf = v_ref[...].astype(jnp.float32)          # (bn, l*d_v)
    bn = q.shape[0]

    # Rows -> lanes relayout: one XLU transpose per operand per tile; the
    # leading-dim split reshapes are free (pure vreg re-indexing).
    qt = q.T                                     # (d_k, bn)
    kt = kf.T.reshape(l, d_k, bn)                # (l, d_k, bn)
    vt = vf.T.reshape(l, d_v, bn)                # (l, d_v, bn)

    # scores[li, n] = (1/T) * sum_d q[n, d] * k[n, li, d]
    s = jnp.sum(kt * qt[None, :, :], axis=1) * inv_temperature   # (l, bn)

    if mask_ref is not None:
        m = mask_ref[...].astype(jnp.float32)    # (l, bn)
        # masked_fill(mask, -inf): truthy (nonzero) => masked.  Fully-masked
        # rows yield NaN, matching the PyTorch reference semantics.
        s = jnp.where(m != 0, -jnp.inf, s)

    # Per-row (per-lane) softmax over l (the sublane axis): tiny XLU reduces.
    s = s - jnp.max(s, axis=0, keepdims=True)
    e = jnp.exp(s)
    denom = jnp.sum(e, axis=0, keepdims=True)    # (1, bn)
    p = e * (1.0 / denom)                        # exact division (rows sum to 1)

    # out^T[dv, n] = sum_l p[l, n] * v[n, l, dv]; reduce over the leading axis
    # -> plain vreg adds, no XLU.
    out_t = jnp.sum(vt * p[:, None, :], axis=0)  # (d_v, bn)

    # Lane-dense, unmasked stores (row dim on lanes for both outputs).
    out_t_ref[...] = out_t.astype(out_t_ref.dtype)
    attn_t_ref[...] = p.astype(attn_t_ref.dtype)


def matrix_vector_scaled_dot_product_attention(q, k, v, temperature, mask=None,
                                               block_n=1024):
    """q: (N, d_k), k: (N, l, d_k), v: (N, l, d_v), mask: (N, l) or None.

    Returns (output (N, d_v), attn (N, l)).

    block_n tuning guidance (lane-dense tiles, double-buffered):
      v5e : 512-1024     v6e : 1024-2048     v7x : 1024-2048 (64 MiB/TC VMEM,
      grid is kept >= 2 steps so both TensorCores get work).
    Default 1024 is safe on every generation.
    """
    N, d_k = q.shape
    _, l, _ = k.shape
    d_v = v.shape[-1]

    # ---- row-tile sizing (no wrapper padding; boundary block handled by
    #      Pallas masked/padded boundary semantics, math is row-local) -------
    if N < 128:
        block_n = N                                   # single exact tile
    else:
        block_n = max(128, (int(block_n) // 128) * 128)
        # keep >= 2 grid steps so the "parallel" axis can shard across
        # TensorCores (v7x megacore); also naturally caps the tile for small N
        block_n = min(block_n, _round_up(pl.cdiv(N, 2), 128))
    grid = (pl.cdiv(N, block_n),)

    # ---- lane-dense flat views of k / v (row-major trailing-dim merge: free)
    k_flat = k.reshape(N, l * d_k)
    v_flat = v.reshape(N, l * d_v)

    in_specs = [
        pl.BlockSpec((block_n, d_k), lambda i: (i, 0)),
        pl.BlockSpec((block_n, l * d_k), lambda i: (i, 0)),
        pl.BlockSpec((block_n, l * d_v), lambda i: (i, 0)),
    ]
    args = [q, k_flat, v_flat]

    masked = mask is not None
    if masked:
        # Transposed (l, N) so rows sit on lanes inside the kernel; this is a
        # tiny wrapper pass (l elements per row).
        mask_t = jnp.transpose(mask).astype(jnp.float32)
        in_specs.append(pl.BlockSpec((l, block_n), lambda i: (0, i)))
        args.append(mask_t)

    kernel = functools.partial(
        _mvsdpa_kernel,
        inv_temperature=1.0 / float(temperature),
        l=l, d_k=d_k, d_v=d_v, masked=masked,
    )

    # ---- VMEM budget from padded tile sizes (double-buffered I/O + compute
    #      temporaries), capped for v7x's 64 MiB per-TC VMEM -----------------
    lane_bn = _round_up(block_n, 128)
    sub = lambda x: _round_up(x, 8)
    io_tile = 4 * block_n * (_round_up(d_k, 128) + l * d_k + l * d_v)  # q,k,v
    io_tile += 4 * lane_bn * (sub(d_v) + sub(l) * (2 if masked else 1))
    scratch = 4 * lane_bn * (l * d_k + l * d_v + sub(d_k) + 4 * sub(l))
    vmem_limit = int(min(max(2 * io_tile + scratch + (4 << 20), 16 << 20),
                         40 << 20))

    out_t, attn_t = pl.pallas_call(
        kernel,
        out_shape=(
            jax.ShapeDtypeStruct((d_v, N), q.dtype),   # out^T, lane-dense
            jax.ShapeDtypeStruct((l, N), q.dtype),     # attn^T, lane-dense
        ),
        grid_spec=pltpu.PrefetchScalarGridSpec(
            num_scalar_prefetch=0,
            grid=grid,
            in_specs=in_specs,
            out_specs=[
                pl.BlockSpec((d_v, block_n), lambda i: (0, i)),
                pl.BlockSpec((l, block_n), lambda i: (0, i)),
            ],
        ),
        compiler_params=pltpu.CompilerParams(
            dimension_semantics=("parallel",),
            vmem_limit_bytes=vmem_limit,
        ),
    )(*args)

    # Back to the module's (N, d_v) / (N, l) contract (small wrapper passes).
    return out_t.T, attn_t.T


def _reference(q, k, v, temperature, mask=None):
    attn = jnp.sum(q[:, None, :] * k, axis=2) / temperature
    if mask is not None:
        attn = jnp.where(mask, -jnp.inf, attn)
    attn = jax.nn.softmax(attn, axis=1)
    out = jnp.sum(attn[:, :, None] * v, axis=1)
    return out, attn


if __name__ == "__main__":
    # small shapes: n*b = 8, l = 8, d_k = 32, d_v = 32
    N, L, D_K, D_V = 8, 8, 32, 32
    temperature = math.sqrt(D_K)

    key = jax.random.PRNGKey(0)
    kq, kk, kv, km, k2 = jax.random.split(key, 5)
    q = jax.random.normal(kq, (N, D_K), dtype=jnp.float32)
    k = jax.random.normal(kk, (N, L, D_K), dtype=jnp.float32)
    v = jax.random.normal(kv, (N, L, D_V), dtype=jnp.float32)

    # --- no-mask path -------------------------------------------------------
    out, attn = matrix_vector_scaled_dot_product_attention(q, k, v, temperature)
    out = jax.block_until_ready(out)
    attn = jax.block_until_ready(attn)
    ref_out, ref_attn = _reference(q, k, v, temperature)
    assert out.shape == (N, D_V) and attn.shape == (N, L)
    assert jnp.allclose(out, ref_out, atol=1e-4, rtol=1e-4)
    assert jnp.allclose(attn, ref_attn, atol=1e-4, rtol=1e-4)

    # --- masked path (no fully-masked rows, to avoid reference NaNs) ---------
    mask = jax.random.bernoulli(km, 0.3, (N, L))
    mask = mask.at[:, 0].set(False)
    out_m, attn_m = matrix_vector_scaled_dot_product_attention(
        q, k, v, temperature, mask=mask)
    out_m = jax.block_until_ready(out_m)
    attn_m = jax.block_until_ready(attn_m)
    ref_out_m, ref_attn_m = _reference(q, k, v, temperature, mask=mask)
    assert jnp.allclose(out_m, ref_out_m, atol=1e-4, rtol=1e-4)
    assert jnp.allclose(attn_m, ref_attn_m, atol=1e-4, rtol=1e-4)

    # --- multi-tile path with a non-divisible boundary block -----------------
    N2 = 300
    kq2, kk2, kv2, km2 = jax.random.split(k2, 4)
    q2 = jax.random.normal(kq2, (N2, D_K), dtype=jnp.float32)
    k2_ = jax.random.normal(kk2, (N2, L, D_K), dtype=jnp.float32)
    v2 = jax.random.normal(kv2, (N2, L, D_V), dtype=jnp.float32)
    mask2 = jax.random.bernoulli(km2, 0.3, (N2, L))
    mask2 = mask2.at[:, 0].set(False)
    out2, attn2 = matrix_vector_scaled_dot_product_attention(
        q2, k2_, v2, temperature, mask=mask2)
    out2 = jax.block_until_ready(out2)
    attn2 = jax.block_until_ready(attn2)
    ref_out2, ref_attn2 = _reference(q2, k2_, v2, temperature, mask=mask2)
    assert out2.shape == (N2, D_V) and attn2.shape == (N2, L)
    assert jnp.allclose(out2, ref_out2, atol=1e-4, rtol=1e-4)
    assert jnp.allclose(attn2, ref_attn2, atol=1e-4, rtol=1e-4)

    print("KERNEL_OK")
</pallas_src>

<mosaic_0001>
module attributes {stable_mosaic.version = 11 : i64} {
  func.func @_mvsdpa_kernel(%arg0: i32, %arg1: memref<8x32xf32, #tpu.memory_space<vmem>>, %arg2: memref<8x256xf32, #tpu.memory_space<vmem>>, %arg3: memref<8x256xf32, #tpu.memory_space<vmem>>, %arg4: memref<32x8xf32, #tpu.memory_space<vmem>>, %arg5: memref<8x8xf32, #tpu.memory_space<vmem>>) attributes {dimension_semantics = [#tpu.dimension_semantics<parallel>], iteration_bounds = array<i64: 1>, scalar_prefetch = 0 : i64, scratch_operands = 0 : i64, tpu.core_type = #tpu.core_type<tc>, window_params = [{transform_indices = @transform_0, window_bounds = array<i64: 8, 32>}, {transform_indices = @transform_1, window_bounds = array<i64: 8, 256>}, {transform_indices = @transform_2, window_bounds = array<i64: 8, 256>}, {transform_indices = @transform_3, window_bounds = array<i64: 32, 8>}, {transform_indices = @transform_4, window_bounds = array<i64: 8, 8>}]} {
    %c0 = arith.constant 0 : index
    %c0_0 = arith.constant 0 : index
    %0 = vector.load %arg1[%c0, %c0_0] : memref<8x32xf32, #tpu.memory_space<vmem>>, vector<8x32xf32>
    %c0_1 = arith.constant 0 : index
    %c0_2 = arith.constant 0 : index
    %1 = vector.load %arg2[%c0_1, %c0_2] : memref<8x256xf32, #tpu.memory_space<vmem>>, vector<8x256xf32>
    %c0_3 = arith.constant 0 : index
    %c0_4 = arith.constant 0 : index
    %2 = vector.load %arg3[%c0_3, %c0_4] : memref<8x256xf32, #tpu.memory_space<vmem>>, vector<8x256xf32>
    %3 = tpu.transpose %0, [1, 0] : vector<8x32xf32> -> vector<32x8xf32>
    %4 = tpu.transpose %1, [1, 0] : vector<8x256xf32> -> vector<256x8xf32>
    %5 = vector.shape_cast %4 : vector<256x8xf32> to vector<8x32x8xf32>
    %6 = tpu.transpose %2, [1, 0] : vector<8x256xf32> -> vector<256x8xf32>
    %7 = vector.shape_cast %6 : vector<256x8xf32> to vector<8x32x8xf32>
    %8 = vector.shape_cast %3 : vector<32x8xf32> to vector<1x32x8xf32>
    %9 = vector.broadcast %8 : vector<1x32x8xf32> to vector<8x32x8xf32>
    %10 = arith.mulf %5, %9 : vector<8x32x8xf32>
    %cst = arith.constant dense<0.000000e+00> : vector<8x8xf32>
    %11 = vector.multi_reduction <add>, %10, %cst [1] : vector<8x32x8xf32> to vector<8x8xf32>
    %cst_5 = arith.constant 0.176776692 : f32
    %12 = vector.broadcast %cst_5 : f32 to vector<8x8xf32>
    %13 = arith.mulf %11, %12 : vector<8x8xf32>
    %cst_6 = arith.constant dense<0xFF800000> : vector<8xf32>
    %14 = vector.multi_reduction <maximumf>, %13, %cst_6 [0] : vector<8x8xf32> to vector<8xf32>
    %15 = vector.shape_cast %14 : vector<8xf32> to vector<1x8xf32>
    %16 = vector.broadcast %15 : vector<1x8xf32> to vector<8x8xf32>
    %17 = arith.subf %13, %16 : vector<8x8xf32>
    %18 = math.exp %17 : vector<8x8xf32>
    %cst_7 = arith.constant dense<0.000000e+00> : vector<8xf32>
    %19 = vector.multi_reduction <add>, %18, %cst_7 [0] : vector<8x8xf32> to vector<8xf32>
    %20 = vector.shape_cast %19 : vector<8xf32> to vector<1x8xf32>
    %cst_8 = arith.constant 1.000000e+00 : f32
    %21 = vector.broadcast %cst_8 : f32 to vector<1x8xf32>
    %22 = arith.divf %21, %20 : vector<1x8xf32>
    %23 = vector.broadcast %22 : vector<1x8xf32> to vector<8x8xf32>
    %24 = arith.mulf %18, %23 : vector<8x8xf32>
    %25 = vector.shape_cast %24 : vector<8x8xf32> to vector<8x1x8xf32>
    %26 = vector.broadcast %25 : vector<8x1x8xf32> to vector<8x32x8xf32>
    %27 = arith.mulf %7, %26 : vector<8x32x8xf32>
    %cst_9 = arith.constant dense<0.000000e+00> : vector<32x8xf32>
    %28 = vector.multi_reduction <add>, %27, %cst_9 [0] : vector<8x32x8xf32> to vector<32x8xf32>
    %c0_10 = arith.constant 0 : index
    %c0_11 = arith.constant 0 : index
    %29 = vector.load %arg4[%c0_10, %c0_11] : memref<32x8xf32, #tpu.memory_space<vmem>>, vector<32x8xf32>
    tpu.vector_store %arg4[%c0_10, %c0_11], %28 {strides = array<i32>} : memref<32x8xf32, #tpu.memory_space<vmem>>, vector<32x8xf32>,
    %c0_12 = arith.constant 0 : index
    %c0_13 = arith.constant 0 : index
    %30 = vector.load %arg5[%c0_12, %c0_13] : memref<8x8xf32, #tpu.memory_space<vmem>>, vector<8x8xf32>
    tpu.vector_store %arg5[%c0_12, %c0_13], %24 {strides = array<i32>} : memref<8x8xf32, #tpu.memory_space<vmem>>, vector<8x8xf32>,
    return
  }
  func.func @transform_0(%arg0: i32) -> (i32, i32) {
    %c0_i32 = arith.constant 0 : i32
    %c0_i32_0 = arith.constant 0 : i32
    return %arg0, %c0_i32 : i32, i32
  }
  func.func @transform_1(%arg0: i32) -> (i32, i32) {
    %c0_i32 = arith.constant 0 : i32
    %c0_i32_0 = arith.constant 0 : i32
    return %arg0, %c0_i32 : i32, i32
  }
  func.func @transform_2(%arg0: i32) -> (i32, i32) {
    %c0_i32 = arith.constant 0 : i32
    %c0_i32_0 = arith.constant 0 : i32
    return %arg0, %c0_i32 : i32, i32
  }
  func.func @transform_3(%arg0: i32) -> (i32, i32) {
    %c0_i32 = arith.constant 0 : i32
    %c0_i32_0 = arith.constant 0 : i32
    return %c0_i32, %arg0 : i32, i32
  }
  func.func @transform_4(%arg0: i32) -> (i32, i32) {
    %c0_i32 = arith.constant 0 : i32
    %c0_i32_0 = arith.constant 0 : i32
    return %c0_i32, %arg0 : i32, i32
  }
}

</mosaic_0001>

<bundles_post_ra>
// kernel: tpu_custom_call.1
= control target key start
LH: loop header
LB: loop body
LE: loop exit
PB: predicated region body
PF: predicated region fallthrough
CT: control target
= control target key end

     0   :  { %10 = vsyncpa [#allocation3], 0  ;;  %s1086_s0 = inlined_call_operand.hbm [shape: f32[8,32], index: 0, kind: input, shape index: {}]   ;;  %s1087_s1 = inlined_call_operand.hbm [shape: f32[8,256], index: 1, kind: input, shape index: {}]   ;;  %s1088_s2 = inlined_call_operand.hbm [shape: f32[8,256], index: 2, kind: input, shape index: {}]   ;;  %s1089_s3 = inlined_call_operand.vmem [shape: f32[32,8], index: 3, kind: output, shape index: {0}]   ;;  %s1090_s4 = inlined_call_operand.hbm [shape: f32[8,8], index: 4, kind: output, shape index: {1}]  }
   0x1   :  { %11 = vsyncpa [#allocation6], 0 }
   0x2   :  { %12 = vsyncpa [#allocation4], 0  ;;  %s733_s15 = smov [#allocation5]   ;;  %s734_s17 = smov [#allocation2]  }
   0x3   :  { %s29_s16 = sshll.u32 %s733_s15, 4  ;;  %s19_s18 = sshll.u32 %s734_s17, 4  ;;  %s30_s16 = int_to_ptr.vmem [resolvable:$true] %s29_s16  ;;  %s20_s18 = int_to_ptr.vmem [resolvable:$true] %s19_s18 }
   0x4   :  { %s655_s19 = scalar_lea.vmem %s30_s16, 256  ;;  %p660_p1 = scmp.lt.s32.totalorder %s30_s16, %s30_s16 }
   0x5   :  { %p656_p0 = scmp.ne.s32.totalorder %s30_s16, %s655_s19  ;;  %p661_p2 = scmp.lt.s32.totalorder %s655_s19, %s655_s19 }
   0x7   :  { %p662_p3 = por %p661_p2, %p660_p1 }
   0x9   :  { %p663_p4 = pnand %p662_p3, %p656_p0 }
   0xb   :  { %666 = shalt.err (!%p663_p4)
}
   0xc   :  { %32 = dma.hbm_to_vmem [thread:$0]  %s1087_s1, 256, %s30_s16, [#allocation6]  }
   0xd   :  { %s675_s22 = scalar_lea.vmem %s20_s18, 128  ;;  %p680_p6 = scmp.lt.s32.totalorder %s20_s18, %s20_s18 }
   0xe   :  { %p676_p5 = scmp.ne.s32.totalorder %s20_s18, %s675_s22  ;;  %p681_p7 = scmp.lt.s32.totalorder %s675_s22, %s675_s22 }
  0x10   :  { %p682_p8 = por %p681_p7, %p680_p6 }
  0x12   :  { %p683_p9 = pnand %p682_p8, %p676_p5 }
  0x14   :  { %686 = shalt.err (!%p683_p9)
}
  0x15   :  { %22 = dma.hbm_to_vmem [thread:$0]  %s1086_s0, 128, %s20_s18, [#allocation3]  }
  0x16   :  { %s735_s25 = smov [#allocation7]  }
  0x17   :  { %s39_s26 = sshll.u32 %s735_s25, 4  ;;  %s40_s26 = int_to_ptr.vmem [resolvable:$true] %s39_s26 }
  0x18   :  { %s695_s27 = scalar_lea.vmem %s40_s26, 256  ;;  %p700_p11 = scmp.lt.s32.totalorder %s40_s26, %s40_s26 }
  0x19   :  { %p696_p10 = scmp.ne.s32.totalorder %s40_s26, %s695_s27  ;;  %p701_p12 = scmp.lt.s32.totalorder %s695_s27, %s695_s27 }
  0x1b   :  { %p702_p13 = por %p701_p12, %p700_p11 }
  0x1d   :  { %p703_p0 = pnand %p702_p13, %p696_p10 }
  0x1f   :  { %706 = shalt.err (!%p703_p0)
}
  0x20   :  { %42 = dma.hbm_to_vmem [thread:$0]  %s1088_s2, 256, %s40_s26, [#allocation6]  }
  0x21   :  { %727 = dma.done.wait [#allocation3], 128  }
  0x22   :  { %728 = vsyncadd [#allocation3], 4294967168 }
  0x23   :  { %729 = dma.done.wait [#allocation6], 512  }
  0x24   :  { %730 = vsyncadd [#allocation6], 4294966784  ;;  %v53_v0 = vld [vmem:[#allocation5] sm:$0xff]  ;;  %v52_v1 = vld [vmem:[#allocation2] sm:$0xff]  ;;  %vm249_vm0 = vcmask 64512   ;;  %vm410_vm1 = vcmask 1041409  }
  0x25   :  { %89 = vxpose.xlu0.b32.start.end [1/1] (short) %v53_v0, 128  ;;  %57 = vxpose.xlu1.b32.start.end [1/1] (short) (narrow) %v52_v1, 32  ;;  %v55_v2 = vld [vmem:[#allocation7] sm:$0xff]  ;;  %v54_v3 = vld [vmem:[#allocation5 + $0x8] sm:$0xff]  ;;  %v56_v4 = vld [vmem:[#allocation7 + $0x8] sm:$0xff]  ;;  %vm413_vm2 = vcmask 1042434   ;;  %vm416_vm3 = vcmask 1043459  }
  0x26   :  { %vm419_vm4 = vcmask 1044484   ;;  %vm422_vm5 = vcmask 1045509   ;;  %vm425_vm6 = vcmask 1046534   ;;  %vm428_vm7 = vcmask 1047559   ;;  %s736_s5 = smov [#allocation8]  }
  0x27   :  { %s612_s6 = sshll.u32 %s736_s5, 4  ;;  %s613_s6 = int_to_ptr.vmem [resolvable:$true] %s612_s6 }
  0x28   :  { %s707_s11 = scalar_lea.vmem %s613_s6, 128  ;;  %p712_p2 = scmp.lt.s32.totalorder %s613_s6, %s613_s6 }
  0x29   :  { %p708_p1 = scmp.ne.s32.totalorder %s613_s6, %s707_s11  ;;  %p713_p3 = scmp.lt.s32.totalorder %s707_s11, %s707_s11 }
  0x2b   :  { %p714_p4 = por %p713_p3, %p712_p2 }
  0x2d   :  { %p715_p5 = pnand %p714_p4, %p708_p1 }
  0x32   :  { %153 = vxpose.xlu1.b32.start.end [1/1] (short) %v55_v2, 128 }
  0x62   :  { %121 = vxpose.xlu0.b32.start.end [1/1] (short) %v54_v3, 128 }
  0x6f   :  { %185 = vxpose.xlu1.b32.start.end [1/1] (short) %v56_v4, 128 }
  0xa1   :  { %v105_v5 = vpop.trf.xlu0  ;;  %v771_v6 = vpop.trf.xlu1 }
  0xa2   :  { %v217_v7 = vmul.f32 %v105_v5, %v771_v6 }
  0xa4   :  { %v250_v11 = vsel %vm249_vm0, %v217_v7, 0.0 }
  0xa5   :  { %v106_v8 = vpop.trf.xlu0  ;;  %v774_v9 = vpop.trf.xlu1 }
  0xa6   :  { %v218_v10 = vmul.f32 %v106_v8, %v774_v9 }
  0xa8   :  { %v251_v12 = vsel %vm249_vm0, %v218_v10, 0.0 }
  0xa9   :  { %v252_v13 = vadd.f32 %v251_v12, %v250_v11  ;;  %v107_v14 = vpop.trf.xlu0  ;;  %v779_v15 = vpop.trf.xlu1 }
  0xaa   :  { %v219_v16 = vmul.f32 %v107_v14, %v779_v15 }
  0xac   :  { %v253_v17 = vsel %vm249_vm0, %v219_v16, 0.0 }
  0xad   :  { %v254_v18 = vadd.f32 %v253_v17, %v252_v13  ;;  %v108_v19 = vpop.trf.xlu0  ;;  %v783_v20 = vpop.trf.xlu1 }
  0xae   :  { %v220_v21 = vmul.f32 %v108_v19, %v783_v20 }
  0xb0   :  { %v255_v22 = vsel %vm249_vm0, %v220_v21, 0.0 }
  0xb1   :  { %v787_v23 = vadd.f32 %v255_v22, %v254_v18  ;;  %v109_v24 = vpop.trf.xlu0  ;;  %v805_v49 = vpop.trf.xlu1 }
  0xb2   :  { %v221_v25 = vmul.f32 %v109_v24, %v771_v6 }
  0xb4   :  { %v263_v28 = vsel %vm249_vm0, %v221_v25, 0.0 }
  0xb5   :  { %v110_v26 = vpop.trf.xlu0  ;;  %v811_v56 = vpop.trf.xlu1 }
  0xb6   :  { %v222_v27 = vmul.f32 %v110_v26, %v774_v9 }
  0xb8   :  { %v264_v29 = vsel %vm249_vm0, %v222_v27, 0.0 }
  0xb9   :  { %v265_v30 = vadd.f32 %v264_v29, %v263_v28  ;;  %v111_v31 = vpop.trf.xlu0  ;;  %v817_v62 = vpop.trf.xlu1 }
  0xba   :  { %v223_v32 = vmul.f32 %v111_v31, %v779_v15 }
  0xbc   :  { %v266_v33 = vsel %vm249_vm0, %v223_v32, 0.0 }
  0xbd   :  { %v267_v34 = vadd.f32 %v266_v33, %v265_v30  ;;  %v112_v35 = vpop.trf.xlu0  ;;  %v822_v7 = vpop.trf.xlu1 }
  0xbe   :  { %v224_v36 = vmul.f32 %v112_v35, %v783_v20 }
  0xc0   :  { %v268_v37 = vsel %vm249_vm0, %v224_v36, 0.0 }
  0xc1   :  { %v797_v38 = vadd.f32 %v268_v37, %v267_v34  ;;  %v113_v39 = vpop.trf.xlu0  ;;  %v827_v12 = vpop.trf.xlu1  ;;  %v257_v34 = vrot.slane %v787_v23, 4 }
  0xc2   :  { %v225_v40 = vmul.f32 %v113_v39, %v771_v6 }
  0xc3   :  { %v270_v35 = vrot.slane %v797_v38, 4 }
  0xc4   :  { %v276_v43 = vsel %vm249_vm0, %v225_v40, 0.0 }
  0xc5   :  { %v114_v41 = vpop.trf.xlu0  ;;  %v833_v21 = vpop.trf.xlu1 }
  0xc6   :  { %v226_v42 = vmul.f32 %v114_v41, %v774_v9 }
  0xc8   :  { %v277_v44 = vsel %vm249_vm0, %v226_v42, 0.0  ;;  %v258_v42 = vadd.f32 %v257_v34, %v787_v23 }
  0xc9   :  { %v278_v45 = vadd.f32 %v277_v44, %v276_v43  ;;  %v115_v46 = vpop.trf.xlu0  ;;  %v839_v30 = vpop.trf.xlu1  ;;  %v271_v43 = vadd.f32 %v270_v35, %v797_v38 }
  0xca   :  { %v227_v47 = vmul.f32 %v115_v46, %v779_v15 }
  0xcc   :  { %v279_v48 = vsel %vm249_vm0, %v227_v47, 0.0 }
  0xcd   :  { %v280_v50 = vadd.f32 %v279_v48, %v278_v45  ;;  %v116_v51 = vpop.trf.xlu0  ;;  %v844_v39 = vpop.trf.xlu1 }
  0xce   :  { %v228_v52 = vmul.f32 %v116_v51, %v783_v20 }
  0xd0   :  { %v281_v53 = vsel %vm249_vm0, %v228_v52, 0.0  ;;  %v259_v52 = vrot.slane %v258_v42, 2 }
  0xd1   :  { %v809_v54 = vadd.f32 %v281_v53, %v280_v50  ;;  %v117_v55 = vpop.trf.xlu0  ;;  %v853_v51 = vpop.trf.xlu1  ;;  %v272_v53 = vrot.slane %v271_v43, 2 }
  0xd2   :  { %v229_v57 = vmul.f32 %v117_v55, %v771_v6 }
  0xd4   :  { %v289_v60 = vsel %vm249_vm0, %v229_v57, 0.0 }
  0xd5   :  { %v118_v58 = vpop.trf.xlu0 }
  0xd6   :  { %v230_v59 = vmul.f32 %v118_v58, %v774_v9 }
  0xd8   :  { %v290_v61 = vsel %vm249_vm0, %v230_v59, 0.0 }
  0xd9   :  { %v291_v63 = vadd.f32 %v290_v61, %v289_v60  ;;  %v119_v0 = vpop.trf.xlu0  ;;  %v273_v60 = vadd.f32 %v272_v53, %v271_v43  ;;  %v260_v61 = vadd.f32 %v259_v52, %v258_v42 }
  0xda   :  { %v231_v1 = vmul.f32 %v119_v0, %v779_v15 }
  0xdc   :  { %v292_v2 = vsel %vm249_vm0, %v231_v1, 0.0  ;;  %v857_v1 = vpop.trf.xlu1 }
  0xdd   :  { %v293_v3 = vadd.f32 %v292_v2, %v291_v63  ;;  %v120_v4 = vpop.trf.xlu0 }
  0xde   :  { %v232_v5 = vmul.f32 %v120_v4, %v783_v20  ;;  %v274_v4 = vrot.slane %v273_v60, 1 }
  0xe0   :  { %v294_v8 = vsel %vm249_vm0, %v232_v5, 0.0  ;;  %v261_v5 = vrot.slane %v260_v61, 1 }
  0xe1   :  { %v825_v10 = vadd.f32 %v294_v8, %v293_v3  ;;  %v137_v11 = vpop.trf.xlu0 }
  0xe2   :  { %v233_v16 = vmul.f32 %v137_v11, %v771_v6 }
  0xe4   :  { %v302_v22 = vsel %vm249_vm0, %v233_v16, 0.0 }
  0xe5   :  { %v138_v13 = vpop.trf.xlu0 }
  0xe6   :  { %v234_v14 = vmul.f32 %v138_v13, %v774_v9 }
  0xe8   :  { %v303_v18 = vsel %vm249_vm0, %v234_v14, 0.0 }
  0xe9   :  { %v139_v17 = vpop.trf.xlu0  ;;  %v304_v25 = vadd.f32 %v303_v18, %v302_v22  ;;  %v861_v18 = vpop.trf.xlu1  ;;  %v262_v22 = vadd.f32 %v261_v5, %v260_v61 }
  0xea   :  { %v235_v19 = vmul.f32 %v139_v17, %v779_v15 }
  0xeb   :  { %v871_v34 = vmul.f32 0.17677669, %v262_v22 }
  0xec   :  { %v305_v24 = vsel %vm249_vm0, %v235_v19, 0.0  ;;  %v275_v19 = vadd.f32 %v274_v4, %v273_v60 }
  0xed   :  { %v140_v26 = vpop.trf.xlu0  ;;  %v306_v28 = vadd.f32 %v305_v24, %v304_v25 }
  0xee   :  { %v236_v27 = vmul.f32 %v140_v26, %v783_v20 }
  0xf0   :  { %v307_v29 = vsel %vm249_vm0, %v236_v27, 0.0 }
  0xf1   :  { %v308_v31 = vadd.f32 %v307_v29, %v306_v28  ;;  %v141_v32 = vpop.trf.xlu0 }
  0xf2   :  { %v237_v41 = vmul.f32 %v141_v32, %v771_v6 }
  0xf3   :  { %v309_v33 = vrot.slane %v308_v31, 4 }
  0xf4   :  { %v315_v48 = vsel %vm249_vm0, %v237_v41, 0.0  ;;  %v874_v41 = vpop.trf.xlu1 }
  0xf5   :  { %v142_v36 = vpop.trf.xlu0  ;;  %v310_v40 = vadd.f32 %v309_v33, %v308_v31  ;;  %v869_v33 = vmul.f32 0.17677669, %v275_v19 }
  0xf6   :  { %v238_v37 = vmul.f32 %v142_v36, %v774_v9 }
  0xf7   :  { %v311_v47 = vrot.slane %v310_v40, 2 }
  0xf8   :  { %v316_v45 = vsel %vm249_vm0, %v238_v37, 0.0 }
  0xf9   :  { %v143_v44 = vpop.trf.xlu0  ;;  %v317_v55 = vadd.f32 %v316_v45, %v315_v48  ;;  %v312_v58 = vadd.f32 %v311_v47, %v310_v40  ;;  %v362_v47 = vsel %vm249_vm0, %v871_v34, -inf }
  0xfa   :  { %v239_v46 = vmul.f32 %v143_v44, %v779_v15 }
  0xfb   :  { %v313_v2 = vrot.slane %v312_v58, 1 }
  0xfc   :  { %v318_v50 = vsel %vm249_vm0, %v239_v46, 0.0  ;;  %v363_v46 = vsel %vm249_vm0, %v869_v33, -inf }
  0xfd   :  { %v144_v57 = vpop.trf.xlu0  ;;  %v319_v38 = vadd.f32 %v318_v50, %v317_v55  ;;  %v314_v14 = vadd.f32 %v313_v2, %v312_v58  ;;  %v887_v58 = vpop.trf.xlu1 }
  0xfe   :  { %v240_v23 = vmul.f32 %v144_v57, %v783_v20 }
  0xff   :  { %v865_v28 = vmul.f32 0.17677669, %v314_v14 }
 0x100   :  { %v320_v59 = vsel %vm249_vm0, %v240_v23, 0.0 }
 0x101   :  { %v321_v63 = vadd.f32 %v320_v59, %v319_v38  ;;  %v145_v0 = vpop.trf.xlu0  ;;  %v366_v42 = vsel %vm249_vm0, %v865_v28, -inf  ;;  %v283_v38 = vrot.slane %v809_v54, 4  ;;  %v296_v59 = vrot.slane %v825_v10, 4 }
 0x102   :  { %v241_v17 = vmul.f32 %v145_v0, %v771_v6  ;;  %v367_v53 = vmax.f32 %v362_v47, %v366_v42 }
 0x103   :  { %v322_v3 = vrot.slane %v321_v63, 4  ;;  %v284_v2 = vadd.f32 %v283_v38, %v809_v54 }
 0x104   :  { %v328_v31 = vsel %vm249_vm0, %v241_v17, 0.0 }
 0x105   :  { %v323_v8 = vadd.f32 %v322_v3, %v321_v63  ;;  %v146_v11 = vpop.trf.xlu0  ;;  %v297_v3 = vadd.f32 %v296_v59, %v825_v10 }
 0x106   :  { %v242_v13 = vmul.f32 %v146_v11, %v774_v9  ;;  %v897_v11 = vpop.trf.xlu1 }
 0x107   :  { %v324_v16 = vrot.slane %v323_v8, 2  ;;  %v298_v17 = vrot.slane %v297_v3, 2 }
 0x108   :  { %v329_v26 = vsel %vm249_vm0, %v242_v13, 0.0 }
 0x109   :  { %v325_v24 = vadd.f32 %v324_v16, %v323_v8  ;;  %v147_v25 = vpop.trf.xlu0  ;;  %v330_v36 = vadd.f32 %v329_v26, %v328_v31  ;;  %v299_v26 = vadd.f32 %v298_v17, %v297_v3 }
 0x10a   :  { %v243_v27 = vmul.f32 %v147_v25, %v779_v15  ;;  %v903_v25 = vpop.trf.xlu1 }
 0x10b   :  { %v326_v29 = vrot.slane %v325_v24, 1 }
 0x10c   :  { %v331_v32 = vsel %vm249_vm0, %v243_v27, 0.0 }
 0x10d   :  { %v327_v35 = vadd.f32 %v326_v29, %v325_v24  ;;  %v148_v37 = vpop.trf.xlu0  ;;  %v332_v44 = vadd.f32 %v331_v32, %v330_v36 }
 0x10e   :  { %v244_v40 = vmul.f32 %v148_v37, %v783_v20  ;;  %v905_v37 = vpop.trf.xlu1 }
 0x10f   :  { %v878_v43 = vmul.f32 0.17677669, %v327_v35  ;;  %v300_v35 = vrot.slane %v299_v26, 1 }
 0x110   :  { %v333_v45 = vsel %vm249_vm0, %v244_v40, 0.0 }
 0x111   :  { %v368_v48 = vsel %vm249_vm0, %v878_v43, -inf  ;;  %v334_v50 = vadd.f32 %v333_v45, %v332_v44  ;;  %v149_v52 = vpop.trf.xlu0 }
 0x112   :  { %v369_v55 = vmax.f32 %v363_v46, %v368_v48  ;;  %v245_v0 = vmul.f32 %v149_v52, %v771_v6  ;;  %v907_v48 = vpop.trf.xlu1 }
 0x113   :  { %v335_v57 = vrot.slane %v334_v50, 4 }
 0x114   :  { %v374_v23 = vmax.f32 %v367_v53, %v369_v55  ;;  %v341_v14 = vsel %vm249_vm0, %v245_v0, 0.0 }
 0x115   :  { %v150_v60 = vpop.trf.xlu0  ;;  %v336_v63 = vadd.f32 %v335_v57, %v334_v50 }
 0x116   :  { %v246_v61 = vmul.f32 %v150_v60, %v774_v9  ;;  %v285_v9 = vrot.slane %v284_v2, 2  ;;  %v913_v0 = vpop.trf.xlu1 }
 0x117   :  { %v337_v13 = vrot.slane %v336_v63, 2 }
 0x118   :  { %v342_v5 = vsel %vm249_vm0, %v246_v61, 0.0 }
 0x119   :  { %v151_v4 = vpop.trf.xlu0  ;;  %v343_v19 = vadd.f32 %v342_v5, %v341_v14  ;;  %v338_v22 = vadd.f32 %v337_v13, %v336_v63 }
 0x11a   :  { %v247_v8 = vmul.f32 %v151_v4, %v779_v15  ;;  %v286_v15 = vadd.f32 %v285_v9, %v284_v2  ;;  %v917_v14 = vpop.trf.xlu1 }
 0x11b   :  { %v339_v29 = vrot.slane %v338_v22, 1 }
 0x11c   :  { %v344_v16 = vsel %vm249_vm0, %v247_v8, 0.0  ;;  %v287_v32 = vrot.slane %v286_v15, 1 }
 0x11d   :  { %v152_v6 = vpop.trf.xlu0  ;;  %v345_v10 = vadd.f32 %v344_v16, %v343_v19  ;;  %v340_v40 = vadd.f32 %v339_v29, %v338_v22 }
 0x11e   :  { %v248_v54 = vmul.f32 %v152_v6, %v783_v20  ;;  %v288_v44 = vadd.f32 %v287_v32, %v286_v15  ;;  %v301_v20 = vadd.f32 %v300_v35, %v299_v26 }
 0x11f   :  { %v360_v46 = vmul.f32 0.17677669, %v340_v40 }
 0x120   :  { %v346_v24 = vsel %vm249_vm0, %v248_v54, 0.0  ;;  %v356_v50 = vmul.f32 0.17677669, %v288_v44  ;;  %v357_v52 = vmul.f32 0.17677669, %v301_v20 }
 0x121   :  { %v347_v27 = vadd.f32 %v346_v24, %v345_v10  ;;  %v370_v55 = vsel %vm249_vm0, %v360_v46, -inf  ;;  %v921_v24 = vpop.trf.xlu1 }
 0x122   :  { %v364_v38 = vsel %vm249_vm0, %v356_v50, -inf  ;;  %v365_v59 = vsel %vm249_vm0, %v357_v52, -inf }
 0x123   :  { %v348_v31 = vrot.slane %v347_v27, 4  ;;  %v371_v61 = vmax.f32 %v364_v38, %v370_v55 }
 0x125   :  { %v349_v36 = vadd.f32 %v348_v31, %v347_v27 }
 0x127   :  { %v350_v42 = vrot.slane %v349_v36, 2 }
 0x129   :  { %v351_v45 = vadd.f32 %v350_v42, %v349_v36 }
 0x12b   :  { %v352_v47 = vrot.slane %v351_v45, 1 }
 0x12d   :  { %v353_v53 = vadd.f32 %v352_v47, %v351_v45 }
 0x12f   :  { %v361_v57 = vmul.f32 0.17677669, %v353_v53 }
 0x131   :  { %v372_v60 = vsel %vm249_vm0, %v361_v57, -inf }
 0x132   :  { %v373_v63 = vmax.f32 %v365_v59, %v372_v60 }
 0x134   :  { %v375_v2 = vmax.f32 %v371_v61, %v373_v63 }
 0x136   :  { %v376_v3 = vmax.f32 %v374_v23, %v375_v2 }
 0x138   :  { %v377_v4 = vsub.f32 %v871_v34, %v376_v3  ;;  %v378_v5 = vsub.f32 %v869_v33, %v376_v3  ;;  %v379_v8 = vsub.f32 %v356_v50, %v376_v3  ;;  %v380_v13 = vsub.f32 %v357_v52, %v376_v3 }
 0x139   :  { %v381_v16 = vsub.f32 %v865_v28, %v376_v3  ;;  %v382_v9 = vsub.f32 %v878_v43, %v376_v3  ;;  %v383_v17 = vsub.f32 %v360_v46, %v376_v3  ;;  %v384_v22 = vsub.f32 %v361_v57, %v376_v3  ;;  %v923_v28 = vpop.trf.xlu1 }
 0x13a   :  { %v385_v19 = vmul.f32 1.442695, %v377_v4  ;;  %v387_v6 = vmul.f32 1.442695, %v378_v5  ;;  %v389_v54 = vmul.f32 1.442695, %v379_v8 }
 0x13b   :  { %v391_v10 = vmul.f32 1.442695, %v380_v13  ;;  %v393_v23 = vmul.f32 1.442695, %v381_v16  ;;  %v395_v34 = vmul.f32 1.442695, %v382_v9 }
 0x13c   :  { %629 = vpow2.f32 %v385_v19  ;;  %v397_v33 = vmul.f32 1.442695, %v383_v17  ;;  %v399_v15 = vmul.f32 1.442695, %v384_v22  ;;  %v440_v19 = vlaneseq }
 0x13d   :  { %631 = vpow2.f32 %v387_v6  ;;  %v925_v27 = vpop.trf.xlu1 }
 0x13e   :  { %633 = vpow2.f32 %v389_v54  ;;  %v441_v6 = vshrl.u32 %v440_v19, 7 }
 0x13f   :  { %635 = vpow2.f32 %v391_v10 }
 0x140   :  { %637 = vpow2.f32 %v393_v23  ;;  %v945_v22 = vsub.s32 0, %v441_v6 }
 0x141   :  { %639 = vpow2.f32 %v395_v34  ;;  %v931_v57 = vpop.trf.xlu1 }
 0x142   :  { %641 = vpow2.f32 %v397_v33 }
 0x143   :  { %643 = vpow2.f32 %v399_v15 }
 0x145   :  { %v937_v3 = vpop.trf.xlu1 }
 0x149   :  { %v630_v43 = vpop.eup %629  ;;  %v939_v13 = vpop.trf.xlu1 }
 0x14a   :  { %v632_v26 = vpop.eup %631 }
 0x14b   :  { %v634_v29 = vpop.eup %633  ;;  %v409_v31 = vrot.slane %v632_v26, 7 }
 0x14c   :  { %v636_v32 = vpop.eup %635  ;;  %v412_v35 = vrot.slane %v634_v29, 6 }
 0x14d   :  { %v638_v36 = vpop.eup %637  ;;  %v411_v40 = vsel %vm410_vm1, %v409_v31, %v630_v43  ;;  %v415_v42 = vrot.slane %v636_v32, 5  ;;  %v941_v17 = vpop.trf.xlu1 }
 0x14e   :  { %v640_v44 = vpop.eup %639  ;;  %v414_v20 = vsel %vm413_vm2, %v412_v35, %v411_v40  ;;  %v418_v45 = vrot.slane %v638_v36, 4 }
 0x14f   :  { %v642_v46 = vpop.eup %641  ;;  %v417_v47 = vsel %vm416_vm3, %v415_v42, %v414_v20  ;;  %v421_v50 = vrot.slane %v640_v44, 3 }
 0x150   :  { %v644_v52 = vpop.eup %643  ;;  %v420_v53 = vsel %vm419_vm4, %v418_v45, %v417_v47  ;;  %v424_v55 = vrot.slane %v642_v46, 2 }
 0x151   :  { %v423_v38 = vsel %vm422_vm5, %v421_v50, %v420_v53  ;;  %v427_v59 = vrot.slane %v644_v52, 1  ;;  %v943_v54 = vpop.trf.xlu1 }
 0x152   :  { %v426_v60 = vsel %vm425_vm6, %v424_v55, %v423_v38 }
 0x153   :  { %v429_v61 = vsel %vm428_vm7, %v427_v59, %v426_v60 }
 0x154   :  { %v431_v63 = vsel %vm249_vm0, %v429_v61, 0.0 }
 0x155   :  { %v432_v2 = vrot.slane %v431_v63, 4  ;;  %v947_v23 = vpop.trf.xlu1 }
 0x157   :  { %v433_v4 = vadd.f32 %v432_v2, %v431_v63 }
 0x159   :  { %v434_v5 = vrot.slane %v433_v4, 2 }
 0x15b   :  { %v435_v8 = vadd.f32 %v434_v5, %v433_v4 }
 0x15d   :  { %v436_v16 = vrot.slane %v435_v8, 1 }
 0x15f   :  { %v437_v9 = vadd.f32 %v436_v16, %v435_v8 }
 0x161   :  { %645 = vrcp.f32 %v437_v9 }
 0x16e   :  { %v646_v10 = vpop.eup %645 }
 0x16f   :  { %v443_v34 = vrot.slane %v646_v10, %v945_v22 }
 0x171   :  { %v950_v33 = vmul.f32 %v630_v43, %v443_v34  ;;  %v952_v15 = vmul.f32 %v632_v26, %v443_v34  ;;  %v954_v31 = vmul.f32 %v634_v29, %v443_v34  ;;  %v956_v35 = vmul.f32 %v636_v32, %v443_v34 }
 0x172   :  { %v958_v40 = vmul.f32 %v638_v36, %v443_v34  ;;  %v960_v42 = vmul.f32 %v640_v44, %v443_v34  ;;  %v962_v20 = vmul.f32 %v642_v46, %v443_v34  ;;  %v964_v45 = vmul.f32 %v644_v52, %v443_v34  ;;  %v976_v44 = vpop.trf.xlu1 }
 0x173   :  { %v455_v47 = vrot.slane %v950_v33, %v945_v22  ;;  %v459_v43 = vrot.slane %v952_v15, %v945_v22  ;;  %v463_v26 = vrot.slane %v954_v31, %v945_v22  ;;  %v588_v29 = vrot.slane %v952_v15, 7 }
 0x174   :  { %v590_v32 = vrot.slane %v954_v31, 6  ;;  %v467_v36 = vrot.slane %v956_v35, %v945_v22 }
 0x175   :  { %v486_v46 = vmul.f32 %v455_v47, %v817_v62  ;;  %v490_v50 = vmul.f32 %v459_v43, %v839_v30  ;;  %v494_v52 = vmul.f32 %v463_v26, %v861_v18  ;;  %v487_v53 = vmul.f32 %v455_v47, %v822_v7 }
 0x176   :  { %v491_v55 = vmul.f32 %v459_v43, %v844_v39  ;;  %v495_v38 = vmul.f32 %v463_v26, %v874_v41  ;;  %v484_v59 = vmul.f32 %v455_v47, %v805_v49  ;;  %v488_v60 = vmul.f32 %v459_v43, %v827_v12  ;;  %v214_v19 = vpop.trf.xlu1 }
 0x177   :  { %v546_v61 = vsel %vm249_vm0, %v486_v46, 0.0  ;;  %v547_v63 = vsel %vm249_vm0, %v490_v50, 0.0  ;;  %v561_v62 = vsel %vm249_vm0, %v487_v53, 0.0  ;;  %v471_v30 = vrot.slane %v958_v40, %v945_v22 }
 0x178   :  { %v548_v18 = vadd.f32 %v547_v63, %v546_v61  ;;  %v549_v7 = vsel %vm249_vm0, %v494_v52, 0.0  ;;  %v562_v39 = vsel %vm249_vm0, %v491_v55, 0.0  ;;  %v492_v41 = vmul.f32 %v463_v26, %v853_v51 }
 0x179   :  { %v563_v2 = vadd.f32 %v562_v39, %v561_v62  ;;  %v516_v49 = vsel %vm249_vm0, %v484_v59, 0.0  ;;  %v517_v12 = vsel %vm249_vm0, %v488_v60, 0.0  ;;  %v496_v4 = vmul.f32 %v467_v36, %v887_v58 }
 0x17a   :  { %v550_v5 = vadd.f32 %v549_v7, %v548_v18  ;;  %v564_v8 = vsel %vm249_vm0, %v495_v38, 0.0  ;;  %v518_v16 = vadd.f32 %v517_v12, %v516_v49  ;;  %v485_v9 = vmul.f32 %v455_v47, %v811_v56 }
 0x17b   :  { %v565_v6 = vadd.f32 %v564_v8, %v563_v2  ;;  %v519_v10 = vsel %vm249_vm0, %v492_v41, 0.0  ;;  %v489_v34 = vmul.f32 %v459_v43, %v833_v21  ;;  %v493_v51 = vmul.f32 %v463_v26, %v857_v1 }
 0x17c   :  { %v520_v46 = vadd.f32 %v519_v10, %v518_v16  ;;  %v592_v50 = vrot.slane %v956_v35, 5  ;;  %v531_v52 = vsel %vm249_vm0, %v485_v9, 0.0  ;;  %v498_v58 = vmul.f32 %v467_v36, %v903_v25 }
 0x17d   :  { %v521_v53 = vsel %vm249_vm0, %v496_v4, 0.0  ;;  %v532_v55 = vsel %vm249_vm0, %v489_v34, 0.0  ;;  %v497_v56 = vmul.f32 %v467_v36, %v897_v11  ;;  %v499_v47 = vmul.f32 %v467_v36, %v905_v37  ;;  %v215_v37 = vpop.trf.xlu1 }
 0x17e   :  { %v522_v38 = vadd.f32 %v521_v53, %v520_v46  ;;  %v533_v59 = vadd.f32 %v532_v55, %v531_v52  ;;  %v534_v21 = vsel %vm249_vm0, %v493_v51, 0.0  ;;  %v551_v1 = vsel %vm249_vm0, %v498_v58, 0.0 }
 0x17f   :  { %v552_v43 = vadd.f32 %v551_v1, %v550_v5  ;;  %v566_v26 = vsel %vm249_vm0, %v499_v47, 0.0  ;;  %v500_v60 = vmul.f32 %v471_v30, %v907_v48  ;;  %v501_v25 = vmul.f32 %v471_v30, %v913_v0 }
 0x180   :  { %v535_v61 = vadd.f32 %v534_v21, %v533_v59  ;;  %v567_v63 = vadd.f32 %v566_v26, %v565_v6  ;;  %v502_v62 = vmul.f32 %v471_v30, %v917_v14  ;;  %v503_v11 = vmul.f32 %v471_v30, %v921_v24 }
 0x181   :  { %v536_v36 = vsel %vm249_vm0, %v497_v56, 0.0  ;;  %v523_v18 = vsel %vm249_vm0, %v500_v60, 0.0  ;;  %v538_v7 = vsel %vm249_vm0, %v501_v25, 0.0  ;;  %v475_v39 = vrot.slane %v960_v42, %v945_v22  ;;  %v216_v34 = vpop.trf.xlu1 }
 0x182   :  { %v537_v41 = vadd.f32 %v536_v36, %v535_v61  ;;  %v524_v48 = vadd.f32 %v523_v18, %v522_v38  ;;  %v553_v0 = vsel %vm249_vm0, %v502_v62, 0.0  ;;  %v568_v2 = vsel %vm249_vm0, %v503_v11, 0.0 }
 0x183   :  { %v554_v49 = vadd.f32 %v553_v0, %v552_v43  ;;  %v569_v14 = vadd.f32 %v568_v2, %v567_v63  ;;  %v504_v24 = vmul.f32 %v475_v39, %v923_v28  ;;  %v505_v30 = vmul.f32 %v475_v39, %v925_v27 }
 0x184   :  { %v539_v12 = vadd.f32 %v538_v7, %v537_v41  ;;  %v506_v4 = vmul.f32 %v475_v39, %v931_v57  ;;  %v507_v5 = vmul.f32 %v475_v39, %v937_v3  ;;  %v479_v8 = vrot.slane %v962_v20, %v945_v22 }
 0x185   :  { %v525_v16 = vsel %vm249_vm0, %v504_v24, 0.0  ;;  %v540_v9 = vsel %vm249_vm0, %v505_v30, 0.0  ;;  %v483_v6 = vrot.slane %v964_v45, %v945_v22  ;;  %v589_v28 = vsel %vm410_vm1, %v588_v29, %v950_v33 }
 0x186   :  { %v526_v27 = vadd.f32 %v525_v16, %v524_v48  ;;  %v541_v10 = vadd.f32 %v540_v9, %v539_v12  ;;  %v555_v57 = vsel %vm249_vm0, %v506_v4, 0.0  ;;  %v570_v3 = vsel %vm249_vm0, %v507_v5, 0.0 }
 0x187   :  { %v556_v51 = vadd.f32 %v555_v57, %v554_v49  ;;  %v571_v46 = vadd.f32 %v570_v3, %v569_v14  ;;  %v508_v52 = vmul.f32 %v479_v8, %v939_v13  ;;  %v509_v58 = vmul.f32 %v479_v8, %v941_v17 }
 0x188   :  { %v510_v22 = vmul.f32 %v479_v8, %v943_v54  ;;  %v511_v53 = vmul.f32 %v479_v8, %v947_v23  ;;  %v512_v15 = vmul.f32 %v483_v6, %v976_v44  ;;  %v513_v33 = vmul.f32 %v483_v6, %v214_v19 }
 0x189   :  { %v527_v29 = vsel %vm249_vm0, %v508_v52, 0.0  ;;  %v542_v55 = vsel %vm249_vm0, %v509_v58, 0.0  ;;  %v514_v56 = vmul.f32 %v483_v6, %v215_v37  ;;  %v515_v47 = vmul.f32 %v483_v6, %v216_v34 }
 0x18a   :  { %v528_v38 = vadd.f32 %v527_v29, %v526_v27  ;;  %v543_v59 = vadd.f32 %v542_v55, %v541_v10  ;;  %v557_v21 = vsel %vm249_vm0, %v510_v22, 0.0  ;;  %v572_v13 = vsel %vm249_vm0, %v511_v53, 0.0 }
 0x18b   :  { %v558_v17 = vadd.f32 %v557_v21, %v556_v51  ;;  %v573_v1 = vadd.f32 %v572_v13, %v571_v46  ;;  %v529_v54 = vsel %vm249_vm0, %v512_v15, 0.0  ;;  %v544_v23 = vsel %vm249_vm0, %v513_v33, 0.0 }
 0x18c   :  { %v530_v44 = vadd.f32 %v529_v54, %v528_v38  ;;  %v545_v19 = vadd.f32 %v544_v23, %v543_v59  ;;  %v559_v43 = vsel %vm249_vm0, %v514_v56, 0.0  ;;  %v574_v26 = vsel %vm249_vm0, %v515_v47, 0.0 }
 0x18d   :  { %v594_v60 = vrot.slane %v958_v40, 4  ;;  %v560_v25 = vadd.f32 %v559_v43, %v558_v17  ;;  %v575_v61 = vadd.f32 %v574_v26, %v573_v1  ;;  %v591_v63 = vsel %vm413_vm2, %v590_v32, %v589_v28 }
 0x18e   :  { %v596_v62 = vrot.slane %v960_v42, 3  ;;  %576 = vst.msk [vmem:[%s1089_s3] sm:$0xff] %vm249_vm0, %v530_v44  ;;  %577 = vst.msk [vmem:[%s1089_s3 + $0x8] sm:$0xff] %vm249_vm0, %v545_v19  ;;  %v593_v40 = vsel %vm416_vm3, %v592_v50, %v591_v63  ;;  %v598_v42 = vrot.slane %v962_v20, 2  ;;  %v600_v32 = vrot.slane %v964_v45, 1 }
 0x18f   :  { %578 = vst.msk [vmem:[%s1089_s3 + $0x10] sm:$0xff] %vm249_vm0, %v560_v25  ;;  %579 = vst.msk [vmem:[%s1089_s3 + $0x18] sm:$0xff] %vm249_vm0, %v575_v61  ;;  %v595_v31 = vsel %vm419_vm4, %v594_v60, %v593_v40 }
 0x190   :  { %v597_v35 = vsel %vm422_vm5, %v596_v62, %v595_v31 }
 0x191   :  { %v599_v50 = vsel %vm425_vm6, %v598_v42, %v597_v35 }
 0x192   :  { %v601_v11 = vsel %vm428_vm7, %v600_v32, %v599_v50 }
 0x193   :  { %603 = vst.msk [vmem:[#allocation8] sm:$0xff] %vm249_vm0, %v601_v11 }
 0x194   :  { %718 = shalt.err (!%p715_p5)
}
 0x195   :  { %615 = dma.vmem_to_hbm [thread:$0]  %s613_s6, 128, %s1090_s4, [#allocation4]  }
 0x196   :  { %731 = dma.done.wait [#allocation4], 128  }
 0x197   :  { %732 = vsyncadd [#allocation4], 4294967168 }
 0x198   :  { %621 = vsyncpa [#allocation3], 1 }
 0x199   :  { %622 = vsyncpa [#allocation6], 1 }
 0x19a   :  { %623 = vsyncpa [#allocation4], 1 }

</bundles_post_ra>
